<compile_context>
chip_gen: v7x
topology: tpu7x:2x2x1
jax: 0.10.0
libtpu: 0.0.40
codegen_flags: <defaults>
</compile_context>

<pallas_src>
import functools
import math

import jax
import jax.numpy as jnp
import numpy as np
from jax import lax
from jax.experimental import pallas as pl
from jax.experimental.pallas import tpu as pltpu


# ----------------------------------------------------------------------------
# Host-side helpers.
# ----------------------------------------------------------------------------
def _interp_matrix_np(n_out, n_in, align_corners=True):
    """Row r holds the two bilinear taps for output index r (PyTorch math)."""
    if align_corners:
        if n_out > 1:
            src = np.arange(n_out, dtype=np.float64) * (n_in - 1) / (n_out - 1)
        else:
            src = np.zeros((n_out,), dtype=np.float64)
    else:
        scale = n_out / n_in
        src = np.clip((np.arange(n_out, dtype=np.float64) + 0.5) / scale - 0.5,
                      0.0, float(n_in - 1))
    i0 = np.clip(np.floor(src).astype(np.int64), 0, n_in - 1)
    i1 = np.clip(i0 + 1, 0, n_in - 1)
    wgt = src - i0
    m = np.zeros((n_out, n_in), dtype=np.float64)
    m[np.arange(n_out), i0] += 1.0 - wgt
    m[np.arange(n_out), i1] += wgt
    return m


@functools.lru_cache(maxsize=None)
def _sep_matrices(h_pad, h, w, ho, wo, factor, dtype_name):
    """Factor-folded A_h of shape (Ho, H_pad) and A_w^T of shape (W, Wo)."""
    dt = jnp.dtype(dtype_name)
    a_h = np.zeros((ho, h_pad), dtype=np.float64)
    a_h[:, :h] = _interp_matrix_np(ho, h) * factor       # zero cols for H padding
    a_w_t = _interp_matrix_np(wo, w).T
    return (jnp.asarray(np.ascontiguousarray(a_h), dtype=dt),
            jnp.asarray(np.ascontiguousarray(a_w_t), dtype=dt))


@functools.lru_cache(maxsize=None)
def _kron_matrix(h, w, ho, wo, factor, dtype_name):
    """(factor * A_h (x) A_w)^T of shape (H*W, Ho*Wo) -- lane-dense output."""
    dt = jnp.dtype(dtype_name)
    a_h = _interp_matrix_np(ho, h) * factor               # (Ho, H)
    a_w = _interp_matrix_np(wo, w)                        # (Wo, W)
    k = np.kron(a_h, a_w)                                 # (Ho*Wo, H*W)
    return jnp.asarray(np.ascontiguousarray(k.T), dtype=dt)


def _ceil_to(v, m):
    return ((v + m - 1) // m) * m


def _padded_bytes(rows, cols, itemsize):
    # crude VMEM footprint honouring the (8, 128) vreg tiling
    return _ceil_to(max(rows, 1), 8) * _ceil_to(max(cols, 1), 128) * itemsize


@functools.lru_cache(maxsize=None)
def _tpu_caps():
    """(has_two_tensorcores, physical VMEM bytes per core) for the local device."""
    vmem_phys = 128 << 20
    two_tc = False
    try:
        info = pltpu.get_tpu_info()
        vmem_phys = int(getattr(info, "vmem_capacity_bytes", vmem_phys))
    except Exception:
        pass
    try:
        kind = jax.devices()[0].device_kind.lower()
        if ("v7" in kind) or ("7x" in kind):
            two_tc = True                      # 2 TensorCores share the HBM stream
            vmem_phys = min(vmem_phys, 64 << 20)
    except Exception:
        pass
    return two_tc, vmem_phys


# ----------------------------------------------------------------------------
# Pallas kernels.
# ----------------------------------------------------------------------------
def _kron_resize_kernel(x_ref, k_ref, o_ref):
    # ONE 2-D MXU matmul: (TB, H*W) @ (H*W, Ho*Wo) -> lane-dense (TB, Ho*Wo).
    o_ref[...] = jnp.dot(x_ref[...], k_ref[...],
                         preferred_element_type=jnp.float32).astype(o_ref.dtype)


def _sep_resize_kernel(x_ref, ah_ref, awt_ref, o_ref):
    tb, h, w = x_ref.shape                    # h is already padded to % 8 == 0
    ho = ah_ref.shape[0]
    two = awt_ref.shape[1]                    # current Wo column block

    x = x_ref[...]                                             # native dtype
    # ---- W-resize: one 2-D MXU matmul, M = TB*H (free-view reshape) ----
    t = jnp.dot(x.reshape(tb * h, w), awt_ref[...],
                preferred_element_type=jnp.float32)            # (TB*H, two) f32
    # NOTE: for bf16 inputs this intermediate is rounded back to bf16 once;
    # within tolerance and keeps both matmul operands in the native dtype.
    t = t.reshape(tb, h, two).astype(x_ref.dtype)
    # ---- H-resize: batched MXU matmul, factor-scaled A_h shared over TB ----
    ah = jnp.broadcast_to(ah_ref[...], (tb, ho, h))            # hoisted once/step
    out = lax.dot_general(ah, t, (((2,), (1,)), ((0,), (0,))),
                          preferred_element_type=jnp.float32)  # (TB, Ho, two)
    o_ref[...] = out.astype(o_ref.dtype)


# ----------------------------------------------------------------------------
# Wrapper.
# ----------------------------------------------------------------------------
def _resize_and_rescale_bilinear(x, factor, _vmem_budget=None):
    n, c, h, w = x.shape
    # Output size matches PyTorch: floor(size * scale_factor) with the scale as
    # a python double (factor = 1/vel_resize). Intentionally identical math.
    ho = int(math.floor(h * factor))
    wo = int(math.floor(w * factor))
    dt = jnp.dtype(x.dtype)
    isz = dt.itemsize
    nc = n * c

    two_tc, vmem_phys = _tpu_caps()
    on_v7x = vmem_phys <= (64 << 20)
    budget = _vmem_budget if _vmem_budget is not None else ((6 << 20) if on_v7x else (16 << 20))
    hard_cap = (48 << 20) if on_v7x else (96 << 20)

    hw, howo = h * w, ho * wo
    kron_bytes = _padded_bytes(hw, howo, isz)
    use_kron = (wo < 128) and (kron_bytes <= (4 << 20))
    # TODO(synk): for Wo < 128 with a large H*W the separable path still pays
    # lane-masked stores; folding adjacent slices into the lane dim needs an
    # output relayout and is skipped.

    if use_kron:
        # ------------------ Kronecker single-matmul path ------------------
        kmat = _kron_matrix(h, w, ho, wo, float(factor), dt.name)
        xf = x.reshape(nc, hw)
        per_slice = (2 * _ceil_to(hw, 128) * isz          # double-buffered input row
                     + 2 * _ceil_to(howo, 128) * isz      # double-buffered output row
                     + _ceil_to(howo, 128) * 4)           # f32 accumulator row
        cap = max(8, int((budget - kron_bytes) // max(per_slice, 1)))
        tb = nc if cap >= nc else max(8, (cap // 8) * 8)   # TB % 8 == 0 or TB == nc
        tb = min(tb, nc)
        if two_tc and nc > 8 and tb >= nc:                 # feed both TensorCores
            tb = min(nc, _ceil_to(pl.cdiv(nc, 2), 8))
        gb = pl.cdiv(nc, tb)                               # ragged last block OK
        vmem_limit = int(min(hard_cap,
                             max(32 << 20, 2 * (tb * per_slice + 2 * kron_bytes))))
        cost = pl.CostEstimate(flops=2 * nc * hw * howo, transcendentals=0,
                               bytes_accessed=(nc * (hw + howo) + hw * howo) * isz)
        out = pl.pallas_call(
            _kron_resize_kernel,
            out_shape=jax.ShapeDtypeStruct((nc, howo), x.dtype),
            grid_spec=pl.GridSpec(
                grid=(gb,),
                in_specs=[pl.BlockSpec((tb, hw), lambda b: (b, 0)),
                          pl.BlockSpec((hw, howo), lambda b: (0, 0))],   # resident
                out_specs=pl.BlockSpec((tb, howo), lambda b: (b, 0)),
            ),
            compiler_params=pltpu.CompilerParams(
                dimension_semantics=("parallel",),
                vmem_limit_bytes=vmem_limit),
            cost_estimate=cost,
        )(xf, kmat)
        return out.reshape(n, c, ho, wo)

    # ---------------------- Separable two-matmul path ----------------------
    # Guarantee H % 8 == 0 so the in-kernel (TB*H, W) reshape is a free view.
    h_pad = _ceil_to(h, 8)
    if h_pad != h:
        x = jnp.pad(x, ((0, 0), (0, 0), (0, h_pad - h), (0, 0)))
    a_h, a_w_t = _sep_matrices(h_pad, h, w, ho, wo, float(factor), dt.name)
    xb = x.reshape(nc, h_pad, w)               # no dtype upcast

    def per_slice_bytes(two_):
        return (2 * _padded_bytes(h_pad, w, isz)      # double-buffered input block
                + 2 * _padded_bytes(ho, two_, isz)    # double-buffered output block
                + _padded_bytes(h_pad, two_, 4)       # f32 W-resized intermediate
                + _padded_bytes(h_pad, two_, isz)     # intermediate cast copy
                + _padded_bytes(ho, two_, 4)          # f32 result before cast
                + _padded_bytes(ho, h_pad, isz))      # broadcast copy of A_h

    # Wo column tile: full Wo if one slice fits the budget, else a 128-multiple
    # block (bounds per-step VMEM; guarantees 128-lane-aligned stores).
    two = wo
    if wo > 128 and per_slice_bytes(wo) > budget:
        two = 128
        for cand in (2048, 1024, 512, 256):
            if cand < wo and per_slice_bytes(cand) <= budget:
                two = cand
                break

    per_slice = per_slice_bytes(two)
    resident = _padded_bytes(ho, h_pad, isz) + 2 * _padded_bytes(w, two, isz)
    cap = max(1, int((budget - resident) // max(per_slice, 1)))
    tb = min(nc, cap)
    gw = pl.cdiv(wo, two)
    gb = pl.cdiv(nc, tb)
    if two_tc and nc > 1:
        # v7x: keep the parallel axis >= 2 and even so both TensorCores are fed.
        if gb == 1:
            gb = 2
        elif gb % 2:
            gb += 1
        tb = pl.cdiv(nc, gb)
        gb = pl.cdiv(nc, tb)
    vmem_limit = int(min(hard_cap, max(32 << 20, 2 * (tb * per_slice + resident))))

    cost = pl.CostEstimate(
        flops=2 * nc * (h_pad * w * wo + ho * h_pad * wo),
        transcendentals=0,
        bytes_accessed=nc * (h_pad * w + ho * wo) * isz + (ho * h_pad + w * wo) * isz)

    # TODO(synk): if xprof shows the input DMA exposed for tiny per-step compute,
    # bump the x in_spec to pipeline_mode=pl.Buffered(3) and account for it above.
    # TODO(synk): for very large f32 fields on v5e a bf16 cast of the matmul
    # operands (keeping f32 accumulation) would relieve the MXU; not applied
    # to preserve f32 numerics.
    out = pl.pallas_call(
        _sep_resize_kernel,
        out_shape=jax.ShapeDtypeStruct((nc, ho, wo), x.dtype),
        grid_spec=pl.GridSpec(
            grid=(gb, gw),
            in_specs=[
                pl.BlockSpec((tb, h_pad, w), lambda b, j: (b, 0, 0)),
                pl.BlockSpec((ho, h_pad), lambda b, j: (0, 0)),   # resident
                pl.BlockSpec((w, two), lambda b, j: (0, j)),
            ],
            out_specs=pl.BlockSpec((tb, ho, two), lambda b, j: (b, 0, j)),
        ),
        compiler_params=pltpu.CompilerParams(
            dimension_semantics=("parallel", "arbitrary"),
            vmem_limit_bytes=vmem_limit),
        cost_estimate=cost,
    )(xb, a_h, a_w_t)
    return out.reshape(n, c, ho, wo)


class ResizeTransform:
    """Pallas port of morphldm.layers.ResizeTransform (resize + rescale a vector field)."""

    def __init__(self, vel_resize, ndims):
        self.factor = 1.0 / vel_resize
        self.mode = 'linear'
        if ndims == 2:
            self.mode = 'bi' + self.mode
        elif ndims == 3:
            self.mode = 'tri' + self.mode

    def __call__(self, x):
        if self.factor == 1.0:
            return x                                   # PyTorch: neither branch triggers
        if self.mode != 'bilinear':
            # TODO(synk): 'linear' (3-D input) and 'trilinear' (5-D input) not ported.
            raise NotImplementedError("only ndims=2 (bilinear, NCHW) is implemented")
        # interpolate-then-scale and scale-then-interpolate commute (interp is
        # linear), so both PyTorch branches reduce to factor * interpolate(x).
        return _resize_and_rescale_bilinear(x, self.factor)


# ----------------------------------------------------------------------------
# Pure-JAX reference with PyTorch's align_corners=True coordinate math.
# ----------------------------------------------------------------------------
def _ref_resize_transform(x, vel_resize):
    factor = 1.0 / vel_resize
    if factor == 1.0:
        return x
    N, C, H, W = x.shape
    Ho, Wo = int(math.floor(H * factor)), int(math.floor(W * factor))

    def coords(n_out, n_in):
        if n_out > 1:
            s = jnp.arange(n_out, dtype=jnp.float32) * (n_in - 1) / (n_out - 1)
        else:
            s = jnp.zeros((n_out,), jnp.float32)
        i0 = jnp.clip(jnp.floor(s).astype(jnp.int32), 0, n_in - 1)
        i1 = jnp.clip(i0 + 1, 0, n_in - 1)
        return i0, i1, s - i0.astype(jnp.float32)

    i0, i1, wi = coords(Ho, H)
    j0, j1, wj = coords(Wo, W)
    g = lambda ii, jj: x[:, :, ii[:, None], jj[None, :]]
    out = ((1 - wi)[:, None] * (1 - wj)[None, :] * g(i0, j0)
           + (1 - wi)[:, None] * wj[None, :] * g(i0, j1)
           + wi[:, None] * (1 - wj)[None, :] * g(i1, j0)
           + wi[:, None] * wj[None, :] * g(i1, j1))
    return factor * out


if __name__ == "__main__":
    key = jax.random.PRNGKey(0)

    # 1) Upsample (factor > 1), Kronecker lane-dense path: vel_resize=0.5 -> 2x.
    N, C, H, W = 2, 2, 16, 16
    x = jax.random.normal(key, (N, C, H, W), dtype=jnp.float32)
    rt_up = ResizeTransform(vel_resize=0.5, ndims=2)
    y = jax.block_until_ready(rt_up(x))
    assert y.shape == (N, C, 32, 32), y.shape
    assert jnp.allclose(y, _ref_resize_transform(x, 0.5), atol=1e-4, rtol=1e-4), \
        "upsample (kron path) mismatch vs reference"

    # 2) Downsample (factor < 1), Kronecker path: vel_resize=2.0 -> 0.5x.
    x2 = jax.random.normal(jax.random.PRNGKey(0), (2, 2, 32, 32), dtype=jnp.float32)
    rt_dn = ResizeTransform(vel_resize=2.0, ndims=2)
    y2 = jax.block_until_ready(rt_dn(x2))
    assert y2.shape == (2, 2, 16, 16), y2.shape
    assert jnp.allclose(y2, _ref_resize_transform(x2, 2.0), atol=1e-4, rtol=1e-4), \
        "downsample (kron path) mismatch vs reference"

    # 3) Separable two-matmul path (Wo >= 128, lane-dense output).
    x3 = jax.random.normal(jax.random.PRNGKey(0), (1, 2, 64, 64), dtype=jnp.float32)
    rt3 = ResizeTransform(vel_resize=0.5, ndims=2)
    y3 = jax.block_until_ready(rt3(x3))
    assert y3.shape == (1, 2, 128, 128), y3.shape
    assert jnp.allclose(y3, _ref_resize_transform(x3, 0.5), atol=1e-4, rtol=1e-4), \
        "separable path mismatch vs reference"

    # 4) Separable path with forced Wo column tiling (tiny budget override):
    #    exercises the 2-axis grid and the ragged/masked last Wo block.
    x4 = jax.random.normal(jax.random.PRNGKey(0), (1, 2, 64, 96), dtype=jnp.float32)
    y4 = jax.block_until_ready(
        _resize_and_rescale_bilinear(x4, 2.0, _vmem_budget=300 << 10))
    assert y4.shape == (1, 2, 128, 192), y4.shape
    assert jnp.allclose(y4, _ref_resize_transform(x4, 0.5), atol=1e-4, rtol=1e-4), \
        "Wo-tiled separable path mismatch vs reference"

    print("KERNEL_OK")
</pallas_src>

<mosaic_0001>
module attributes {stable_mosaic.version = 11 : i64} {
  func.func @_kron_resize_kernel(%arg0: i32, %arg1: memref<4x256xf32, #tpu.memory_space<vmem>>, %arg2: memref<256x1024xf32, #tpu.memory_space<vmem>>, %arg3: memref<4x1024xf32, #tpu.memory_space<vmem>>) attributes {dimension_semantics = [#tpu.dimension_semantics<parallel>], iteration_bounds = array<i64: 1>, scalar_prefetch = 0 : i64, scratch_operands = 0 : i64, tpu.core_type = #tpu.core_type<tc>, window_params = [{transform_indices = @transform_0, window_bounds = array<i64: 4, 256>}, {pipeline_mode = #tpu.pipeline_mode<synchronous>, transform_indices = @transform_1, window_bounds = array<i64: 256, 1024>}, {transform_indices = @transform_2, window_bounds = array<i64: 4, 1024>}]} {
    %c0 = arith.constant 0 : index
    %c0_0 = arith.constant 0 : index
    %0 = vector.load %arg1[%c0, %c0_0] : memref<4x256xf32, #tpu.memory_space<vmem>>, vector<4x256xf32>
    %c0_1 = arith.constant 0 : index
    %c0_2 = arith.constant 0 : index
    %1 = vector.load %arg2[%c0_1, %c0_2] : memref<256x1024xf32, #tpu.memory_space<vmem>>, vector<256x1024xf32>
    %cst = arith.constant dense<0.000000e+00> : vector<4x1024xf32>
    %2 = tpu.matmul %0, %1, %cst {dimension_numbers = #tpu.dot_dimension_numbers<[1], [0], [0], [1], [0, 0, 1, 1], [], []>} : vector<4x256xf32>, vector<256x1024xf32>, vector<4x1024xf32> -> vector<4x1024xf32>
    %c0_3 = arith.constant 0 : index
    %c0_4 = arith.constant 0 : index
    %3 = vector.load %arg3[%c0_3, %c0_4] : memref<4x1024xf32, #tpu.memory_space<vmem>>, vector<4x1024xf32>
    tpu.vector_store %arg3[%c0_3, %c0_4], %2 {strides = array<i32>} : memref<4x1024xf32, #tpu.memory_space<vmem>>, vector<4x1024xf32>,
    return
  }
  func.func @transform_0(%arg0: i32) -> (i32, i32) {
    %c0_i32 = arith.constant 0 : i32
    %c0_i32_0 = arith.constant 0 : i32
    return %arg0, %c0_i32 : i32, i32
  }
  func.func @transform_1(%arg0: i32) -> (i32, i32) {
    %c0_i32 = arith.constant 0 : i32
    %c0_i32_0 = arith.constant 0 : i32
    %c0_i32_1 = arith.constant 0 : i32
    return %c0_i32, %c0_i32_0 : i32, i32
  }
  func.func @transform_2(%arg0: i32) -> (i32, i32) {
    %c0_i32 = arith.constant 0 : i32
    %c0_i32_0 = arith.constant 0 : i32
    return %arg0, %c0_i32 : i32, i32
  }
}

</mosaic_0001>

<bundles_post_ra>
// kernel: tpu_custom_call.1
= control target key start
LH: loop header
LB: loop body
LE: loop exit
PB: predicated region body
PF: predicated region fallthrough
CT: control target
= control target key end

     0   :  { %7 = vsyncpa [#allocation3], 0  ;;  %s1029_s0 = inlined_call_operand.hbm [shape: f32[4,256], index: 0, kind: input, shape index: {}]   ;;  %s1030_s1 = inlined_call_operand.hbm [shape: f32[256,1024], index: 1, kind: input, shape index: {}]   ;;  %s1031_s2 = inlined_call_operand.hbm [shape: f32[4,1024], index: 2, kind: output, shape index: {}]  }
   0x1   :  { %8 = vsyncpa [#allocation6], 0 }
   0x2   :  { %9 = vsyncpa [#allocation4], 0  ;;  %s952_s9 = smov [#allocation2]   ;;  %s953_s11 = smov [#allocation5]  }
   0x3   :  { %s16_s10 = sshll.u32 %s952_s9, 4  ;;  %s25_s12 = sshll.u32 %s953_s11, 4  ;;  %s17_s10 = int_to_ptr.vmem [resolvable:$true] %s16_s10  ;;  %s972_s12 = int_to_ptr.vmem [resolvable:$true] %s25_s12 }
   0x4   :  { %s880_s15 = scalar_lea.hbm %s1029_s0, 128 }
   0x5   :  { %p881_p0 = scmp.ne.s32.totalorder %s1029_s0, %s880_s15  ;;  %p884_p1 = scmp.lt.u32.totalorder %s880_s15, %s1029_s0 }
   0x7   :  { %p886_p2 = pnand %p884_p1, %p881_p0 }
   0x9   :  { %889 = shalt.err (!%p886_p2)
}
   0xa   :  { %s890_s20 = scalar_lea.vmem %s17_s10, 128  ;;  %p895_p4 = scmp.lt.s32.totalorder %s17_s10, %s17_s10 }
   0xb   :  { %p891_p3 = scmp.ne.s32.totalorder %s17_s10, %s890_s20  ;;  %p896_p5 = scmp.lt.s32.totalorder %s890_s20, %s890_s20 }
   0xd   :  { %p897_p6 = por %p896_p5, %p895_p4 }
   0xf   :  { %p898_p7 = pnand %p897_p6, %p891_p3 }
  0x11   :  { %901 = shalt.err (!%p898_p7)
}
  0x12   :  { %19 = dma.hbm_to_vmem [thread:$0]  %s1029_s0, 128, %s17_s10, [#allocation3]  }
  0x13   :  { %s902_s25 = scalar_lea.hbm %s1030_s1, 32768 }
  0x14   :  { %p903_p8 = scmp.ne.s32.totalorder %s1030_s1, %s902_s25  ;;  %p906_p9 = scmp.lt.u32.totalorder %s902_s25, %s1030_s1 }
  0x16   :  { %p908_p10 = pnand %p906_p9, %p903_p8 }
  0x18   :  { %911 = shalt.err (!%p908_p10)
}
  0x19   :  { %s912_s30 = scalar_lea.vmem %s972_s12, 32768  ;;  %p917_p12 = scmp.lt.s32.totalorder %s972_s12, %s972_s12 }
  0x1a   :  { %p913_p11 = scmp.ne.s32.totalorder %s972_s12, %s912_s30  ;;  %p918_p13 = scmp.lt.s32.totalorder %s912_s30, %s912_s30 }
  0x1c   :  { %p919_p0 = por %p918_p13, %p917_p12 }
  0x1e   :  { %p920_p1 = pnand %p919_p0, %p913_p11 }
  0x20   :  { %923 = shalt.err (!%p920_p1)
}
  0x21   :  { %s954_s0 = smov 1024   ;;  %s955_s3 = smov 64  }
  0x22   :  { %31 = dma.hbm_to_vmem [thread:$0]  %s1030_s1, 32768, %s972_s12, [#allocation6], %s954_s0, %s954_s0, %s955_s3  }
  0x23   :  { %946 = dma.done.wait [#allocation3], 128  }
  0x24   :  { %947 = vsyncadd [#allocation3], 4294967168 }
  0x25   :  { %948 = dma.done.wait [#allocation6], 32768  }
  0x26   :  { %949 = vsyncadd [#allocation6], 4294934528  ;;  %v40_v0 = vld [vmem:[#allocation5 + $0x8] sm:$0xff]  ;;  %v42_v2 = vld [vmem:[#allocation5 + $0x18] sm:$0xff]  ;;  %s956_s1 = smov [#allocation7]  }
  0x27   :  { %v48_v1 = vld [vmem:[#allocation5 + $0x48] sm:$0xff]  ;;  %v50_v4 = vld [vmem:[#allocation5 + $0x58] sm:$0xff]  ;;  %v39_v5 = vld [vmem:[#allocation5] sm:$0xff]  ;;  %s608_s6 = sshll.u32 %s956_s1, 4  ;;  %s609_s6 = int_to_ptr.vmem [resolvable:$true] %s608_s6 }
  0x28   :  { %v618_v3 = vpack.c.bf16 %v48_v1, %v40_v0  ;;  %v47_v6 = vld [vmem:[#allocation5 + $0x40] sm:$0xff]  ;;  %v682_v7 = vpack.c.bf16 %v50_v4, %v42_v2  ;;  %v41_v9 = vld [vmem:[#allocation5 + $0x10] sm:$0xff]  ;;  %v56_v11 = vld [vmem:[#allocation5 + $0x88] sm:$0xff]  ;;  %s924_s7 = scalar_lea.vmem %s609_s6, 512  ;;  %p929_p3 = scmp.lt.s32.totalorder %s609_s6, %s609_s6 }
  0x29   :  { %v620_v8 = vpack.c.bf16 %v47_v6, %v39_v5  ;;  %v49_v10 = vld [vmem:[#allocation5 + $0x50] sm:$0xff]  ;;  %v64_v13 = vld [vmem:[#allocation5 + $0xc8] sm:$0xff]  ;;  %v58_v14 = vld [vmem:[#allocation5 + $0x98] sm:$0xff]  ;;  %p925_p2 = scmp.ne.s32.totalorder %s609_s6, %s924_s7  ;;  %p930_p4 = scmp.lt.s32.totalorder %s924_s7, %s924_s7 }
  0x2a   :  { %619 = vmatprep.subr.bf16.mxu0 %v618_v3  ;;  %v684_v12 = vpack.c.bf16 %v49_v10, %v41_v9  ;;  %v66_v15 = vld [vmem:[#allocation5 + $0xd8] sm:$0xff]  ;;  %683 = vmatprep.subr.bf16.mxu1 %v682_v7  ;;  %v622_v16 = vpack.c.bf16 %v64_v13, %v56_v11  ;;  %v55_v18 = vld [vmem:[#allocation5 + $0x80] sm:$0xff]  ;;  %v57_v20 = vld [vmem:[#allocation5 + $0x90] sm:$0xff] }
  0x2b   :  { %621 = vmatpush1.bf16.msra.mxu0 %v620_v8  ;;  %v686_v17 = vpack.c.bf16 %v66_v15, %v58_v14  ;;  %v63_v19 = vld [vmem:[#allocation5 + $0xc0] sm:$0xff]  ;;  %v65_v22 = vld [vmem:[#allocation5 + $0xd0] sm:$0xff]  ;;  %v72_v23 = vld [vmem:[#allocation5 + $0x108] sm:$0xff]  ;;  %p931_p5 = por %p930_p4, %p929_p3 }
  0x2c   :  { %685 = vmatpush1.bf16.msra.mxu1 %v684_v12  ;;  %v624_v21 = vpack.c.bf16 %v63_v19, %v55_v18  ;;  %v80_v24 = vld [vmem:[#allocation5 + $0x148] sm:$0xff]  ;;  %623 = vmatprep.subr.bf16.mxu0 %v622_v16  ;;  %v688_v25 = vpack.c.bf16 %v65_v22, %v57_v20  ;;  %v74_v27 = vld [vmem:[#allocation5 + $0x118] sm:$0xff]  ;;  %v71_v29 = vld [vmem:[#allocation5 + $0x100] sm:$0xff] }
  0x2d   :  { %687 = vmatprep.subr.bf16.mxu1 %v686_v17  ;;  %v626_v26 = vpack.c.bf16 %v80_v24, %v72_v23  ;;  %v82_v28 = vld [vmem:[#allocation5 + $0x158] sm:$0xff]  ;;  %v79_v31 = vld [vmem:[#allocation5 + $0x140] sm:$0xff]  ;;  %v73_v32 = vld [vmem:[#allocation5 + $0x110] sm:$0xff]  ;;  %p932_p6 = pnand %p931_p5, %p925_p2 }
  0x2e   :  { %v690_v30 = vpack.c.bf16 %v82_v28, %v74_v27  ;;  %v81_v33 = vld [vmem:[#allocation5 + $0x150] sm:$0xff]  ;;  %v628_v34 = vpack.c.bf16 %v79_v31, %v71_v29  ;;  %v88_v35 = vld [vmem:[#allocation5 + $0x188] sm:$0xff]  ;;  %v90_v37 = vld [vmem:[#allocation5 + $0x198] sm:$0xff] }
  0x2f   :  { %625 = vmatpush1.bf16.msra.mxu0 %v624_v21  ;;  %v96_v36 = vld [vmem:[#allocation5 + $0x1c8] sm:$0xff]  ;;  %v692_v38 = vpack.c.bf16 %v81_v33, %v73_v32  ;;  %v98_v40 = vld [vmem:[#allocation5 + $0x1d8] sm:$0xff]  ;;  %v87_v41 = vld [vmem:[#allocation5 + $0x180] sm:$0xff] }
  0x30   :  { %689 = vmatpush1.bf16.msra.mxu1 %v688_v25  ;;  %627 = vmatprep.subr.bf16.mxu0 %v626_v26  ;;  %v630_v39 = vpack.c.bf16 %v96_v36, %v88_v35  ;;  %v95_v42 = vld [vmem:[#allocation5 + $0x1c0] sm:$0xff]  ;;  %v694_v43 = vpack.c.bf16 %v98_v40, %v90_v37  ;;  %v89_v44 = vld [vmem:[#allocation5 + $0x190] sm:$0xff]  ;;  %v104_v46 = vld [vmem:[#allocation5 + $0x208] sm:$0xff] }
  0x31   :  { %691 = vmatprep.subr.bf16.mxu1 %v690_v30  ;;  %v97_v45 = vld [vmem:[#allocation5 + $0x1d0] sm:$0xff]  ;;  %v112_v47 = vld [vmem:[#allocation5 + $0x248] sm:$0xff]  ;;  %v106_v48 = vld [vmem:[#allocation5 + $0x218] sm:$0xff]  ;;  %v632_v50 = vpack.c.bf16 %v95_v42, %v87_v41 }
  0x32   :  { %v114_v49 = vld [vmem:[#allocation5 + $0x258] sm:$0xff]  ;;  %v696_v51 = vpack.c.bf16 %v97_v45, %v89_v44  ;;  %v634_v52 = vpack.c.bf16 %v112_v47, %v104_v46  ;;  %v103_v53 = vld [vmem:[#allocation5 + $0x200] sm:$0xff]  ;;  %v105_v55 = vld [vmem:[#allocation5 + $0x210] sm:$0xff] }
  0x33   :  { %629 = vmatpush1.bf16.msra.mxu0 %v628_v34  ;;  %v111_v54 = vld [vmem:[#allocation5 + $0x240] sm:$0xff]  ;;  %v698_v56 = vpack.c.bf16 %v114_v49, %v106_v48  ;;  %v113_v57 = vld [vmem:[#allocation5 + $0x250] sm:$0xff]  ;;  %v120_v58 = vld [vmem:[#allocation5 + $0x288] sm:$0xff] }
  0x34   :  { %693 = vmatpush1.bf16.msra.mxu1 %v692_v38  ;;  %631 = vmatprep.subr.bf16.mxu0 %v630_v39  ;;  %v128_v59 = vld [vmem:[#allocation5 + $0x2c8] sm:$0xff]  ;;  %v122_v60 = vld [vmem:[#allocation5 + $0x298] sm:$0xff]  ;;  %v636_v62 = vpack.c.bf16 %v111_v54, %v103_v53  ;;  %v700_v63 = vpack.c.bf16 %v113_v57, %v105_v55  ;;  %v119_v1 = vld [vmem:[#allocation5 + $0x280] sm:$0xff] }
  0x35   :  { %695 = vmatprep.subr.bf16.mxu1 %v694_v43  ;;  %v130_v61 = vld [vmem:[#allocation5 + $0x2d8] sm:$0xff]  ;;  %v638_v0 = vpack.c.bf16 %v128_v59, %v120_v58  ;;  %v127_v2 = vld [vmem:[#allocation5 + $0x2c0] sm:$0xff]  ;;  %v121_v3 = vld [vmem:[#allocation5 + $0x290] sm:$0xff] }
  0x36   :  { %v702_v4 = vpack.c.bf16 %v130_v61, %v122_v60  ;;  %v129_v5 = vld [vmem:[#allocation5 + $0x2d0] sm:$0xff]  ;;  %v136_v6 = vld [vmem:[#allocation5 + $0x308] sm:$0xff]  ;;  %v138_v8 = vld [vmem:[#allocation5 + $0x318] sm:$0xff]  ;;  %v640_v10 = vpack.c.bf16 %v127_v2, %v119_v1 }
  0x37   :  { %633 = vmatpush1.bf16.msra.mxu0 %v632_v50  ;;  %v144_v7 = vld [vmem:[#allocation5 + $0x348] sm:$0xff]  ;;  %v146_v9 = vld [vmem:[#allocation5 + $0x358] sm:$0xff]  ;;  %v704_v11 = vpack.c.bf16 %v129_v5, %v121_v3  ;;  %v135_v13 = vld [vmem:[#allocation5 + $0x300] sm:$0xff] }
  0x38   :  { %697 = vmatpush1.bf16.msra.mxu1 %v696_v51  ;;  %635 = vmatprep.subr.bf16.mxu0 %v634_v52  ;;  %v642_v12 = vpack.c.bf16 %v144_v7, %v136_v6  ;;  %v143_v14 = vld [vmem:[#allocation5 + $0x340] sm:$0xff]  ;;  %v137_v15 = vld [vmem:[#allocation5 + $0x310] sm:$0xff]  ;;  %v706_v16 = vpack.c.bf16 %v146_v9, %v138_v8  ;;  %v152_v18 = vld [vmem:[#allocation5 + $0x388] sm:$0xff] }
  0x39   :  { %699 = vmatprep.subr.bf16.mxu1 %v698_v56  ;;  %v145_v17 = vld [vmem:[#allocation5 + $0x350] sm:$0xff]  ;;  %v160_v19 = vld [vmem:[#allocation5 + $0x3c8] sm:$0xff]  ;;  %v154_v20 = vld [vmem:[#allocation5 + $0x398] sm:$0xff]  ;;  %v644_v22 = vpack.c.bf16 %v143_v14, %v135_v13 }
  0x3a   :  { %v162_v21 = vld [vmem:[#allocation5 + $0x3d8] sm:$0xff]  ;;  %v708_v23 = vpack.c.bf16 %v145_v17, %v137_v15  ;;  %v646_v24 = vpack.c.bf16 %v160_v19, %v152_v18  ;;  %v151_v25 = vld [vmem:[#allocation5 + $0x380] sm:$0xff]  ;;  %v153_v27 = vld [vmem:[#allocation5 + $0x390] sm:$0xff] }
  0x3b   :  { %637 = vmatpush1.bf16.msra.mxu0 %v636_v62  ;;  %v159_v26 = vld [vmem:[#allocation5 + $0x3c0] sm:$0xff]  ;;  %v710_v28 = vpack.c.bf16 %v162_v21, %v154_v20  ;;  %v161_v29 = vld [vmem:[#allocation5 + $0x3d0] sm:$0xff]  ;;  %v168_v30 = vld [vmem:[#allocation5 + $0x408] sm:$0xff] }
  0x3c   :  { %701 = vmatpush1.bf16.msra.mxu1 %v700_v63  ;;  %639 = vmatprep.subr.bf16.mxu0 %v638_v0  ;;  %v176_v31 = vld [vmem:[#allocation5 + $0x448] sm:$0xff]  ;;  %v170_v32 = vld [vmem:[#allocation5 + $0x418] sm:$0xff]  ;;  %v648_v34 = vpack.c.bf16 %v159_v26, %v151_v25  ;;  %v712_v35 = vpack.c.bf16 %v161_v29, %v153_v27  ;;  %v167_v37 = vld [vmem:[#allocation5 + $0x400] sm:$0xff] }
  0x3d   :  { %703 = vmatprep.subr.bf16.mxu1 %v702_v4  ;;  %v178_v33 = vld [vmem:[#allocation5 + $0x458] sm:$0xff]  ;;  %v650_v36 = vpack.c.bf16 %v176_v31, %v168_v30  ;;  %v175_v38 = vld [vmem:[#allocation5 + $0x440] sm:$0xff]  ;;  %v169_v39 = vld [vmem:[#allocation5 + $0x410] sm:$0xff] }
  0x3e   :  { %v714_v40 = vpack.c.bf16 %v178_v33, %v170_v32  ;;  %v177_v41 = vld [vmem:[#allocation5 + $0x450] sm:$0xff]  ;;  %v184_v42 = vld [vmem:[#allocation5 + $0x488] sm:$0xff]  ;;  %v186_v44 = vld [vmem:[#allocation5 + $0x498] sm:$0xff]  ;;  %v652_v46 = vpack.c.bf16 %v175_v38, %v167_v37 }
  0x3f   :  { %641 = vmatpush1.bf16.msra.mxu0 %v640_v10  ;;  %v192_v43 = vld [vmem:[#allocation5 + $0x4c8] sm:$0xff]  ;;  %v194_v45 = vld [vmem:[#allocation5 + $0x4d8] sm:$0xff]  ;;  %v716_v47 = vpack.c.bf16 %v177_v41, %v169_v39  ;;  %v183_v49 = vld [vmem:[#allocation5 + $0x480] sm:$0xff] }
  0x40   :  { %705 = vmatpush1.bf16.msra.mxu1 %v704_v11  ;;  %643 = vmatprep.subr.bf16.mxu0 %v642_v12  ;;  %v654_v48 = vpack.c.bf16 %v192_v43, %v184_v42  ;;  %v191_v50 = vld [vmem:[#allocation5 + $0x4c0] sm:$0xff]  ;;  %v185_v51 = vld [vmem:[#allocation5 + $0x490] sm:$0xff]  ;;  %v718_v52 = vpack.c.bf16 %v194_v45, %v186_v44  ;;  %v200_v54 = vld [vmem:[#allocation5 + $0x508] sm:$0xff] }
  0x41   :  { %707 = vmatprep.subr.bf16.mxu1 %v706_v16  ;;  %v193_v53 = vld [vmem:[#allocation5 + $0x4d0] sm:$0xff]  ;;  %v208_v55 = vld [vmem:[#allocation5 + $0x548] sm:$0xff]  ;;  %v202_v56 = vld [vmem:[#allocation5 + $0x518] sm:$0xff]  ;;  %v656_v58 = vpack.c.bf16 %v191_v50, %v183_v49 }
  0x42   :  { %v210_v57 = vld [vmem:[#allocation5 + $0x558] sm:$0xff]  ;;  %v720_v59 = vpack.c.bf16 %v193_v53, %v185_v51  ;;  %v658_v60 = vpack.c.bf16 %v208_v55, %v200_v54  ;;  %v199_v61 = vld [vmem:[#allocation5 + $0x500] sm:$0xff]  ;;  %v201_v63 = vld [vmem:[#allocation5 + $0x510] sm:$0xff] }
  0x43   :  { %645 = vmatpush1.bf16.msra.mxu0 %v644_v22  ;;  %v207_v62 = vld [vmem:[#allocation5 + $0x540] sm:$0xff]  ;;  %v722_v0 = vpack.c.bf16 %v210_v57, %v202_v56  ;;  %v209_v1 = vld [vmem:[#allocation5 + $0x550] sm:$0xff]  ;;  %v216_v2 = vld [vmem:[#allocation5 + $0x588] sm:$0xff] }
  0x44   :  { %709 = vmatpush1.bf16.msra.mxu1 %v708_v23  ;;  %647 = vmatprep.subr.bf16.mxu0 %v646_v24  ;;  %v224_v3 = vld [vmem:[#allocation5 + $0x5c8] sm:$0xff]  ;;  %v218_v4 = vld [vmem:[#allocation5 + $0x598] sm:$0xff]  ;;  %v660_v6 = vpack.c.bf16 %v207_v62, %v199_v61  ;;  %v215_v7 = vld [vmem:[#allocation5 + $0x580] sm:$0xff]  ;;  %v724_v8 = vpack.c.bf16 %v209_v1, %v201_v63 }
  0x45   :  { %711 = vmatprep.subr.bf16.mxu1 %v710_v28  ;;  %v226_v5 = vld [vmem:[#allocation5 + $0x5d8] sm:$0xff]  ;;  %v662_v9 = vpack.c.bf16 %v224_v3, %v216_v2  ;;  %v223_v10 = vld [vmem:[#allocation5 + $0x5c0] sm:$0xff]  ;;  %v217_v11 = vld [vmem:[#allocation5 + $0x590] sm:$0xff] }
  0x46   :  { %v225_v12 = vld [vmem:[#allocation5 + $0x5d0] sm:$0xff]  ;;  %v726_v13 = vpack.c.bf16 %v226_v5, %v218_v4  ;;  %v232_v14 = vld [vmem:[#allocation5 + $0x608] sm:$0xff]  ;;  %v1003_v16 = vld [vmem:[#allocation2] sm:$0xff]  ;;  %v664_v20 = vpack.c.bf16 %v223_v10, %v215_v7 }
  0x47   :  { %649 = vmatpush1.bf16.msra.mxu0 %v648_v34  ;;  %v240_v15 = vld [vmem:[#allocation5 + $0x648] sm:$0xff]  ;;  %v234_v17 = vld [vmem:[#allocation5 + $0x618] sm:$0xff]  ;;  %v1007_v19 = vcombine.high %v1003_v16, %v1003_v16  ;;  %v728_v21 = vpack.c.bf16 %v225_v12, %v217_v11  ;;  %v231_v23 = vld [vmem:[#allocation5 + $0x600] sm:$0xff] }
  0x48   :  { %713 = vmatpush1.bf16.msra.mxu1 %v712_v35  ;;  %651 = vmatprep.subr.bf16.mxu0 %v650_v36  ;;  %v242_v18 = vld [vmem:[#allocation5 + $0x658] sm:$0xff]  ;;  %v666_v22 = vpack.c.bf16 %v240_v15, %v232_v14  ;;  %v239_v24 = vld [vmem:[#allocation5 + $0x640] sm:$0xff]  ;;  %v233_v25 = vld [vmem:[#allocation5 + $0x610] sm:$0xff] }
  0x49   :  { %715 = vmatprep.subr.bf16.mxu1 %v714_v40  ;;  %v730_v26 = vpack.c.bf16 %v242_v18, %v234_v17  ;;  %v241_v27 = vld [vmem:[#allocation5 + $0x650] sm:$0xff]  ;;  %v248_v28 = vld [vmem:[#allocation5 + $0x688] sm:$0xff]  ;;  %362 = vmatprep.mubr.f32.mxu0 %v1007_v19  ;;  %v250_v30 = vld [vmem:[#allocation5 + $0x698] sm:$0xff]  ;;  %v668_v32 = vpack.c.bf16 %v239_v24, %v231_v23 }
  0x4a   :  { %v256_v29 = vld [vmem:[#allocation5 + $0x6c8] sm:$0xff]  ;;  %v258_v31 = vld [vmem:[#allocation5 + $0x6d8] sm:$0xff]  ;;  %433 = vmatprep.mubr.f32.mxu1 %v1007_v19  ;;  %v732_v33 = vpack.c.bf16 %v241_v27, %v233_v25  ;;  %v247_v35 = vld [vmem:[#allocation5 + $0x680] sm:$0xff] }
  0x4b   :  { %653 = vmatpush1.bf16.msra.mxu0 %v652_v46  ;;  %v670_v34 = vpack.c.bf16 %v256_v29, %v248_v28  ;;  %v255_v36 = vld [vmem:[#allocation5 + $0x6c0] sm:$0xff]  ;;  %v249_v37 = vld [vmem:[#allocation5 + $0x690] sm:$0xff]  ;;  %v734_v38 = vpack.c.bf16 %v258_v31, %v250_v30  ;;  %v264_v40 = vld [vmem:[#allocation5 + $0x708] sm:$0xff] }
  0x4c   :  { %717 = vmatpush1.bf16.msra.mxu1 %v716_v47  ;;  %655 = vmatprep.subr.bf16.mxu0 %v654_v48  ;;  %v257_v39 = vld [vmem:[#allocation5 + $0x6d0] sm:$0xff]  ;;  %v272_v41 = vld [vmem:[#allocation5 + $0x748] sm:$0xff]  ;;  %v266_v42 = vld [vmem:[#allocation5 + $0x718] sm:$0xff]  ;;  %v672_v44 = vpack.c.bf16 %v255_v36, %v247_v35 }
  0x4d   :  { %719 = vmatprep.subr.bf16.mxu1 %v718_v52  ;;  %v274_v43 = vld [vmem:[#allocation5 + $0x758] sm:$0xff]  ;;  %v736_v45 = vpack.c.bf16 %v257_v39, %v249_v37  ;;  %v674_v46 = vpack.c.bf16 %v272_v41, %v264_v40  ;;  %v263_v47 = vld [vmem:[#allocation5 + $0x700] sm:$0xff]  ;;  %v265_v49 = vld [vmem:[#allocation5 + $0x710] sm:$0xff] }
  0x4e   :  { %v271_v48 = vld [vmem:[#allocation5 + $0x740] sm:$0xff]  ;;  %v738_v50 = vpack.c.bf16 %v274_v43, %v266_v42  ;;  %v273_v51 = vld [vmem:[#allocation5 + $0x750] sm:$0xff]  ;;  %v280_v52 = vld [vmem:[#allocation5 + $0x788] sm:$0xff] }
  0x4f   :  { %657 = vmatpush1.bf16.msra.mxu0 %v656_v58  ;;  %v288_v53 = vld [vmem:[#allocation5 + $0x7c8] sm:$0xff]  ;;  %v282_v54 = vld [vmem:[#allocation5 + $0x798] sm:$0xff]  ;;  %v676_v56 = vpack.c.bf16 %v271_v48, %v263_v47  ;;  %v740_v57 = vpack.c.bf16 %v273_v51, %v265_v49  ;;  %v281_v61 = vld [vmem:[#allocation5 + $0x790] sm:$0xff] }
  0x50   :  { %721 = vmatpush1.bf16.msra.mxu1 %v720_v59  ;;  %659 = vmatprep.subr.bf16.mxu0 %v658_v60  ;;  %v290_v55 = vld [vmem:[#allocation5 + $0x7d8] sm:$0xff]  ;;  %v678_v58 = vpack.c.bf16 %v288_v53, %v280_v52  ;;  %v279_v59 = vld [vmem:[#allocation5 + $0x780] sm:$0xff]  ;;  %v289_v63 = vld [vmem:[#allocation5 + $0x7d0] sm:$0xff] }
  0x51   :  { %723 = vmatprep.subr.bf16.mxu1 %v722_v0  ;;  %v287_v60 = vld [vmem:[#allocation5 + $0x7c0] sm:$0xff]  ;;  %v742_v62 = vpack.c.bf16 %v290_v55, %v282_v54  ;;  %v44_v0 = vld [vmem:[#allocation5 + $0x28] sm:$0xff]  ;;  %v46_v2 = vld [vmem:[#allocation5 + $0x38] sm:$0xff]  ;;  %v744_v5 = vpack.c.bf16 %v289_v63, %v281_v61 }
  0x52   :  { %v52_v1 = vld [vmem:[#allocation5 + $0x68] sm:$0xff]  ;;  %v54_v3 = vld [vmem:[#allocation5 + $0x78] sm:$0xff]  ;;  %v680_v4 = vpack.c.bf16 %v287_v60, %v279_v59  ;;  %v43_v7 = vld [vmem:[#allocation5 + $0x20] sm:$0xff] }
  0x53   :  { %661 = vmatpush1.bf16.msra.mxu0 %v660_v6  ;;  %v746_v6 = vpack.c.bf16 %v52_v1, %v44_v0  ;;  %v810_v10 = vpack.c.bf16 %v54_v3, %v46_v2  ;;  %v53_v11 = vld [vmem:[#allocation5 + $0x70] sm:$0xff]  ;;  %v60_v12 = vld [vmem:[#allocation5 + $0xa8] sm:$0xff]  ;;  %v62_v14 = vld [vmem:[#allocation5 + $0xb8] sm:$0xff] }
  0x54   :  { %725 = vmatpush1.bf16.msra.mxu1 %v724_v8  ;;  %663 = vmatprep.subr.bf16.mxu0 %v662_v9  ;;  %v51_v8 = vld [vmem:[#allocation5 + $0x60] sm:$0xff]  ;;  %v45_v9 = vld [vmem:[#allocation5 + $0x30] sm:$0xff]  ;;  %v70_v15 = vld [vmem:[#allocation5 + $0xf8] sm:$0xff] }
  0x55   :  { %727 = vmatprep.subr.bf16.mxu1 %v726_v13  ;;  %v68_v13 = vld [vmem:[#allocation5 + $0xe8] sm:$0xff]  ;;  %v748_v17 = vpack.c.bf16 %v51_v8, %v43_v7  ;;  %v812_v18 = vpack.c.bf16 %v53_v11, %v45_v9  ;;  %v61_v23 = vld [vmem:[#allocation5 + $0xb0] sm:$0xff]  ;;  %v814_v24 = vpack.c.bf16 %v70_v15, %v62_v14  ;;  %v78_v28 = vld [vmem:[#allocation5 + $0x138] sm:$0xff] }
  0x56   :  { %v69_v25 = vld [vmem:[#allocation5 + $0xf0] sm:$0xff]  ;;  %v84_v27 = vld [vmem:[#allocation5 + $0x168] sm:$0xff]  ;;  %v86_v29 = vld [vmem:[#allocation5 + $0x178] sm:$0xff] }
  0x57   :  { %665 = vmatpush1.bf16.msra.mxu0 %v664_v20  ;;  %v750_v20 = vpack.c.bf16 %v68_v13, %v60_v12  ;;  %v816_v31 = vpack.c.bf16 %v69_v25, %v61_v23  ;;  %v77_v35 = vld [vmem:[#allocation5 + $0x130] sm:$0xff]  ;;  %v818_v36 = vpack.c.bf16 %v86_v29, %v78_v28  ;;  %v100_v39 = vld [vmem:[#allocation5 + $0x1e8] sm:$0xff]  ;;  %v94_v40 = vld [vmem:[#allocation5 + $0x1b8] sm:$0xff] }
  0x58   :  { %729 = vmatpush1.bf16.msra.mxu1 %v728_v21  ;;  %667 = vmatprep.subr.bf16.mxu0 %v666_v22  ;;  %v59_v21 = vld [vmem:[#allocation5 + $0xa0] sm:$0xff]  ;;  %v85_v37 = vld [vmem:[#allocation5 + $0x170] sm:$0xff]  ;;  %v102_v41 = vld [vmem:[#allocation5 + $0x1f8] sm:$0xff] }
  0x59   :  { %731 = vmatprep.subr.bf16.mxu1 %v730_v26  ;;  %v67_v22 = vld [vmem:[#allocation5 + $0xe0] sm:$0xff]  ;;  %v76_v26 = vld [vmem:[#allocation5 + $0x128] sm:$0xff]  ;;  %v820_v43 = vpack.c.bf16 %v85_v37, %v77_v35  ;;  %v93_v47 = vld [vmem:[#allocation5 + $0x1b0] sm:$0xff]  ;;  %v822_v48 = vpack.c.bf16 %v102_v41, %v94_v40 }
  0x5a   :  { %v752_v30 = vpack.c.bf16 %v67_v22, %v59_v21  ;;  %v101_v49 = vld [vmem:[#allocation5 + $0x1f0] sm:$0xff]  ;;  %v116_v51 = vld [vmem:[#allocation5 + $0x268] sm:$0xff]  ;;  %v110_v52 = vld [vmem:[#allocation5 + $0x238] sm:$0xff] }
  0x5b   :  { %669 = vmatpush1.bf16.msra.mxu0 %v668_v32  ;;  %v754_v32 = vpack.c.bf16 %v84_v27, %v76_v26  ;;  %v118_v53 = vld [vmem:[#allocation5 + $0x278] sm:$0xff]  ;;  %v117_v60 = vld [vmem:[#allocation5 + $0x270] sm:$0xff]  ;;  %v124_v61 = vld [vmem:[#allocation5 + $0x2a8] sm:$0xff] }
  0x5c   :  { %733 = vmatpush1.bf16.msra.mxu1 %v732_v33  ;;  %671 = vmatprep.subr.bf16.mxu0 %v670_v34  ;;  %v75_v33 = vld [vmem:[#allocation5 + $0x120] sm:$0xff]  ;;  %v826_v59 = vpack.c.bf16 %v118_v53, %v110_v52  ;;  %v126_v63 = vld [vmem:[#allocation5 + $0x2b8] sm:$0xff]  ;;  %v133_v8 = vld [vmem:[#allocation5 + $0x2f0] sm:$0xff] }
  0x5d   :  { %735 = vmatprep.subr.bf16.mxu1 %v734_v38  ;;  %v83_v34 = vld [vmem:[#allocation5 + $0x160] sm:$0xff]  ;;  %v92_v38 = vld [vmem:[#allocation5 + $0x1a8] sm:$0xff]  ;;  %v134_v0 = vld [vmem:[#allocation5 + $0x2f8] sm:$0xff] }
  0x5e   :  { %v756_v42 = vpack.c.bf16 %v83_v34, %v75_v33  ;;  %v830_v7 = vpack.c.bf16 %v134_v0, %v126_v63  ;;  %v140_v9 = vld [vmem:[#allocation5 + $0x328] sm:$0xff]  ;;  %v142_v11 = vld [vmem:[#allocation5 + $0x338] sm:$0xff]  ;;  %v149_v22 = vld [vmem:[#allocation5 + $0x370] sm:$0xff] }
  0x5f   :  { %673 = vmatpush1.bf16.msra.mxu0 %v672_v44  ;;  %v758_v44 = vpack.c.bf16 %v100_v39, %v92_v38  ;;  %v150_v12 = vld [vmem:[#allocation5 + $0x378] sm:$0xff]  ;;  %v156_v23 = vld [vmem:[#allocation5 + $0x3a8] sm:$0xff]  ;;  %v165_v34 = vld [vmem:[#allocation5 + $0x3f0] sm:$0xff] }
  0x60   :  { %737 = vmatpush1.bf16.msra.mxu1 %v736_v45  ;;  %675 = vmatprep.subr.bf16.mxu0 %v674_v46  ;;  %v91_v45 = vld [vmem:[#allocation5 + $0x1a0] sm:$0xff]  ;;  %v834_v21 = vpack.c.bf16 %v150_v12, %v142_v11  ;;  %v158_v25 = vld [vmem:[#allocation5 + $0x3b8] sm:$0xff]  ;;  %v172_v35 = vld [vmem:[#allocation5 + $0x428] sm:$0xff] }
  0x61   :  { %739 = vmatprep.subr.bf16.mxu1 %v738_v50  ;;  %v99_v46 = vld [vmem:[#allocation5 + $0x1e0] sm:$0xff]  ;;  %v108_v50 = vld [vmem:[#allocation5 + $0x228] sm:$0xff]  ;;  %v166_v26 = vld [vmem:[#allocation5 + $0x3f8] sm:$0xff] }
  0x62   :  { %v760_v54 = vpack.c.bf16 %v99_v46, %v91_v45  ;;  %v762_v55 = vpack.c.bf16 %v116_v51, %v108_v50  ;;  %v838_v33 = vpack.c.bf16 %v166_v26, %v158_v25  ;;  %v174_v37 = vld [vmem:[#allocation5 + $0x438] sm:$0xff]  ;;  %v181_v46 = vld [vmem:[#allocation5 + $0x470] sm:$0xff] }
  0x63   :  { %677 = vmatpush1.bf16.msra.mxu0 %v676_v56  ;;  %v107_v56 = vld [vmem:[#allocation5 + $0x220] sm:$0xff]  ;;  %v182_v38 = vld [vmem:[#allocation5 + $0x478] sm:$0xff] }
  0x64   :  { %741 = vmatpush1.bf16.msra.mxu1 %v740_v57  ;;  %679 = vmatprep.subr.bf16.mxu0 %v678_v58  ;;  %v115_v57 = vld [vmem:[#allocation5 + $0x260] sm:$0xff]  ;;  %v109_v58 = vld [vmem:[#allocation5 + $0x230] sm:$0xff]  ;;  %v842_v45 = vpack.c.bf16 %v182_v38, %v174_v37  ;;  %v198_v50 = vld [vmem:[#allocation5 + $0x4f8] sm:$0xff] }
  0x65   :  { %743 = vmatprep.subr.bf16.mxu1 %v742_v62  ;;  %v132_v62 = vld [vmem:[#allocation5 + $0x2e8] sm:$0xff]  ;;  %v764_v1 = vpack.c.bf16 %v115_v57, %v107_v56  ;;  %v828_v2 = vpack.c.bf16 %v117_v60, %v109_v58  ;;  %v197_v57 = vld [vmem:[#allocation5 + $0x4f0] sm:$0xff]  ;;  %v206_v60 = vld [vmem:[#allocation5 + $0x538] sm:$0xff] }
  0x66   :  { %v766_v3 = vpack.c.bf16 %v132_v62, %v124_v61  ;;  %v204_v58 = vld [vmem:[#allocation5 + $0x528] sm:$0xff]  ;;  %v214_v61 = vld [vmem:[#allocation5 + $0x578] sm:$0xff] }
  0x67   :  { %681 = vmatpush1.bf16.msra.mxu0 %v680_v4  ;;  %v123_v4 = vld [vmem:[#allocation5 + $0x2a0] sm:$0xff] }
  0x68   :  { %745 = vmatpush1.bf16.msra.mxu1 %v744_v5  ;;  %747 = vmatprep.subr.bf16.mxu0 %v746_v6  ;;  %v131_v5 = vld [vmem:[#allocation5 + $0x2e0] sm:$0xff]  ;;  %v125_v6 = vld [vmem:[#allocation5 + $0x2b0] sm:$0xff] }
  0x69   :  { %811 = vmatprep.subr.bf16.mxu1 %v810_v10  ;;  %v148_v10 = vld [vmem:[#allocation5 + $0x368] sm:$0xff]  ;;  %v768_v13 = vpack.c.bf16 %v131_v5, %v123_v4  ;;  %v832_v14 = vpack.c.bf16 %v133_v8, %v125_v6  ;;  %v850_v4 = vpack.c.bf16 %v214_v61, %v206_v60  ;;  %v213_v5 = vld [vmem:[#allocation5 + $0x570] sm:$0xff]  ;;  %v222_v8 = vld [vmem:[#allocation5 + $0x5b8] sm:$0xff] }
  0x6a   :  { %363 = vmatmul.mubr.f32.vlgmr.msra.gmra.mrb[0].mxu0 %v1003_v16  ;;  %v770_v15 = vpack.c.bf16 %v148_v10, %v140_v9  ;;  %v220_v6 = vld [vmem:[#allocation5 + $0x5a8] sm:$0xff]  ;;  %v230_v9 = vld [vmem:[#allocation5 + $0x5f8] sm:$0xff] }
  0x6b   :  { %434 = vmatmul.mubr.f32.vlgmr.msra.gmra.mrb[0].mxu1 %v1003_v16  ;;  %749 = vmatpush1.bf16.msra.mxu0 %v748_v17  ;;  %v139_v17 = vld [vmem:[#allocation5 + $0x320] sm:$0xff] }
  0x6c   :  { %813 = vmatpush1.bf16.msra.mxu1 %v812_v18  ;;  %751 = vmatprep.subr.bf16.mxu0 %v750_v20  ;;  %v147_v18 = vld [vmem:[#allocation5 + $0x360] sm:$0xff]  ;;  %v141_v20 = vld [vmem:[#allocation5 + $0x330] sm:$0xff] }
  0x6d   :  { %815 = vmatprep.subr.bf16.mxu1 %v814_v24  ;;  %504 = vmatprep.mubr.f32.mxu0 %v1007_v19  ;;  %v164_v24 = vld [vmem:[#allocation5 + $0x3e8] sm:$0xff]  ;;  %v772_v27 = vpack.c.bf16 %v147_v18, %v139_v17  ;;  %v836_v28 = vpack.c.bf16 %v149_v22, %v141_v20  ;;  %v854_v17 = vpack.c.bf16 %v230_v9, %v222_v8  ;;  %v229_v18 = vld [vmem:[#allocation5 + $0x5f0] sm:$0xff]  ;;  %v238_v22 = vld [vmem:[#allocation5 + $0x638] sm:$0xff] }
  0x6e   :  { %575 = vmatprep.mubr.f32.mxu1 %v1007_v19  ;;  %v824_v19 = vpack.c.bf16 %v101_v49, %v93_v47  ;;  %v774_v29 = vpack.c.bf16 %v164_v24, %v156_v23  ;;  %v188_v47 = vld [vmem:[#allocation5 + $0x4a8] sm:$0xff]  ;;  %v190_v49 = vld [vmem:[#allocation5 + $0x4b8] sm:$0xff] }
  0x6f   :  { %753 = vmatpush1.bf16.msra.mxu0 %v752_v30  ;;  %v155_v30 = vld [vmem:[#allocation5 + $0x3a0] sm:$0xff]  ;;  %v846_v56 = vpack.c.bf16 %v198_v50, %v190_v49  ;;  %v236_v20 = vld [vmem:[#allocation5 + $0x628] sm:$0xff]  ;;  %v246_v23 = vld [vmem:[#allocation5 + $0x678] sm:$0xff] }
  0x70   :  { %817 = vmatpush1.bf16.msra.mxu1 %v816_v31  ;;  %755 = vmatprep.subr.bf16.mxu0 %v754_v32  ;;  %v163_v31 = vld [vmem:[#allocation5 + $0x3e0] sm:$0xff]  ;;  %v157_v32 = vld [vmem:[#allocation5 + $0x3b0] sm:$0xff] }
  0x71   :  { %819 = vmatprep.subr.bf16.mxu1 %v818_v36  ;;  %v180_v36 = vld [vmem:[#allocation5 + $0x468] sm:$0xff]  ;;  %v776_v39 = vpack.c.bf16 %v163_v31, %v155_v30  ;;  %v840_v40 = vpack.c.bf16 %v165_v34, %v157_v32  ;;  %v858_v30 = vpack.c.bf16 %v246_v23, %v238_v22  ;;  %v245_v31 = vld [vmem:[#allocation5 + $0x670] sm:$0xff]  ;;  %v254_v34 = vld [vmem:[#allocation5 + $0x6b8] sm:$0xff] }
  0x72   :  { %v778_v41 = vpack.c.bf16 %v180_v36, %v172_v35  ;;  %v252_v32 = vld [vmem:[#allocation5 + $0x6a8] sm:$0xff]  ;;  %v262_v35 = vld [vmem:[#allocation5 + $0x6f8] sm:$0xff] }
  0x73   :  { %757 = vmatpush1.bf16.msra.mxu0 %v756_v42  ;;  %v171_v42 = vld [vmem:[#allocation5 + $0x420] sm:$0xff] }
  0x74   :  { %821 = vmatpush1.bf16.msra.mxu1 %v820_v43  ;;  %759 = vmatprep.subr.bf16.mxu0 %v758_v44  ;;  %v179_v43 = vld [vmem:[#allocation5 + $0x460] sm:$0xff]  ;;  %v173_v44 = vld [vmem:[#allocation5 + $0x430] sm:$0xff] }
  0x75   :  { %823 = vmatprep.subr.bf16.mxu1 %v822_v48  ;;  %v196_v48 = vld [vmem:[#allocation5 + $0x4e8] sm:$0xff]  ;;  %v780_v51 = vpack.c.bf16 %v179_v43, %v171_v42  ;;  %v844_v52 = vpack.c.bf16 %v181_v46, %v173_v44  ;;  %v862_v42 = vpack.c.bf16 %v262_v35, %v254_v34  ;;  %v261_v43 = vld [vmem:[#allocation5 + $0x6f0] sm:$0xff]  ;;  %v270_v46 = vld [vmem:[#allocation5 + $0x738] sm:$0xff] }
  0x76   :  { %v782_v53 = vpack.c.bf16 %v196_v48, %v188_v47  ;;  %v268_v44 = vld [vmem:[#allocation5 + $0x728] sm:$0xff]  ;;  %v278_v47 = vld [vmem:[#allocation5 + $0x778] sm:$0xff] }
  0x77   :  { %761 = vmatpush1.bf16.msra.mxu0 %v760_v54  ;;  %v187_v54 = vld [vmem:[#allocation5 + $0x4a0] sm:$0xff] }
  0x78   :  { %825 = vmatpush1.bf16.msra.mxu1 %v824_v19  ;;  %763 = vmatprep.subr.bf16.mxu0 %v762_v55  ;;  %v195_v19 = vld [vmem:[#allocation5 + $0x4e0] sm:$0xff]  ;;  %v189_v55 = vld [vmem:[#allocation5 + $0x4b0] sm:$0xff] }
  0x79   :  { %827 = vmatprep.subr.bf16.mxu1 %v826_v59  ;;  %v212_v59 = vld [vmem:[#allocation5 + $0x568] sm:$0xff]  ;;  %v784_v62 = vpack.c.bf16 %v195_v19, %v187_v54  ;;  %v848_v63 = vpack.c.bf16 %v197_v57, %v189_v55  ;;  %v866_v54 = vpack.c.bf16 %v278_v47, %v270_v46  ;;  %v277_v19 = vld [vmem:[#allocation5 + $0x770] sm:$0xff]  ;;  %v286_v57 = vld [vmem:[#allocation5 + $0x7b8] sm:$0xff] }
  0x7a   :  { %v786_v0 = vpack.c.bf16 %v212_v59, %v204_v58  ;;  %v284_v55 = vld [vmem:[#allocation5 + $0x7a8] sm:$0xff]  ;;  %v294_v58 = vld [vmem:[#allocation5 + $0x7f8] sm:$0xff] }
  0x7b   :  { %765 = vmatpush1.bf16.msra.mxu0 %v764_v1  ;;  %v203_v1 = vld [vmem:[#allocation5 + $0x520] sm:$0xff] }
  0x7c   :  { %829 = vmatpush1.bf16.msra.mxu1 %v828_v2  ;;  %767 = vmatprep.subr.bf16.mxu0 %v766_v3  ;;  %v211_v2 = vld [vmem:[#allocation5 + $0x560] sm:$0xff]  ;;  %v205_v3 = vld [vmem:[#allocation5 + $0x530] sm:$0xff] }
  0x7d   :  { %831 = vmatprep.subr.bf16.mxu1 %v830_v7  ;;  %v228_v7 = vld [vmem:[#allocation5 + $0x5e8] sm:$0xff]  ;;  %v788_v10 = vpack.c.bf16 %v211_v2, %v203_v1  ;;  %v852_v11 = vpack.c.bf16 %v213_v5, %v205_v3  ;;  %v285_v1 = vld [vmem:[#allocation5 + $0x7b0] sm:$0xff] }
  0x7e   :  { %v790_v12 = vpack.c.bf16 %v228_v7, %v220_v6  ;;  %v293_v2 = vld [vmem:[#allocation5 + $0x7f0] sm:$0xff] }
  0x7f   :  { %769 = vmatpush1.bf16.msra.mxu0 %v768_v13  ;;  %v219_v13 = vld [vmem:[#allocation5 + $0x5a0] sm:$0xff] }
  0x80   :  { %833 = vmatpush1.bf16.msra.mxu1 %v832_v14  ;;  %771 = vmatprep.subr.bf16.mxu0 %v770_v15  ;;  %v227_v14 = vld [vmem:[#allocation5 + $0x5e0] sm:$0xff]  ;;  %v221_v15 = vld [vmem:[#allocation5 + $0x5b0] sm:$0xff] }
  0x81   :  { %835 = vmatprep.subr.bf16.mxu1 %v834_v21  ;;  %v244_v21 = vld [vmem:[#allocation5 + $0x668] sm:$0xff]  ;;  %v792_v24 = vpack.c.bf16 %v227_v14, %v219_v13  ;;  %v856_v25 = vpack.c.bf16 %v229_v18, %v221_v15 }
  0x82   :  { %v794_v26 = vpack.c.bf16 %v244_v21, %v236_v20 }
  0x83   :  { %773 = vmatpush1.bf16.msra.mxu0 %v772_v27  ;;  %v235_v27 = vld [vmem:[#allocation5 + $0x620] sm:$0xff] }
  0x84   :  { %837 = vmatpush1.bf16.msra.mxu1 %v836_v28  ;;  %775 = vmatprep.subr.bf16.mxu0 %v774_v29  ;;  %v243_v28 = vld [vmem:[#allocation5 + $0x660] sm:$0xff]  ;;  %v237_v29 = vld [vmem:[#allocation5 + $0x630] sm:$0xff] }
  0x85   :  { %839 = vmatprep.subr.bf16.mxu1 %v838_v33  ;;  %v260_v33 = vld [vmem:[#allocation5 + $0x6e8] sm:$0xff]  ;;  %v796_v36 = vpack.c.bf16 %v243_v28, %v235_v27  ;;  %v860_v37 = vpack.c.bf16 %v245_v31, %v237_v29 }
  0x86   :  { %v798_v38 = vpack.c.bf16 %v260_v33, %v252_v32 }
  0x87   :  { %777 = vmatpush1.bf16.msra.mxu0 %v776_v39  ;;  %v251_v39 = vld [vmem:[#allocation5 + $0x6a0] sm:$0xff] }
  0x88   :  { %841 = vmatpush1.bf16.msra.mxu1 %v840_v40  ;;  %779 = vmatprep.subr.bf16.mxu0 %v778_v41  ;;  %v259_v40 = vld [vmem:[#allocation5 + $0x6e0] sm:$0xff]  ;;  %v253_v41 = vld [vmem:[#allocation5 + $0x6b0] sm:$0xff] }
  0x89   :  { %843 = vmatprep.subr.bf16.mxu1 %v842_v45  ;;  %v276_v45 = vld [vmem:[#allocation5 + $0x768] sm:$0xff]  ;;  %v800_v48 = vpack.c.bf16 %v259_v40, %v251_v39  ;;  %v864_v49 = vpack.c.bf16 %v261_v43, %v253_v41 }
  0x8a   :  { %v802_v50 = vpack.c.bf16 %v276_v45, %v268_v44 }
  0x8b   :  { %781 = vmatpush1.bf16.msra.mxu0 %v780_v51  ;;  %v267_v51 = vld [vmem:[#allocation5 + $0x720] sm:$0xff] }
  0x8c   :  { %845 = vmatpush1.bf16.msra.mxu1 %v844_v52  ;;  %783 = vmatprep.subr.bf16.mxu0 %v782_v53  ;;  %v275_v52 = vld [vmem:[#allocation5 + $0x760] sm:$0xff]  ;;  %v269_v53 = vld [vmem:[#allocation5 + $0x730] sm:$0xff] }
  0x8d   :  { %847 = vmatprep.subr.bf16.mxu1 %v846_v56  ;;  %v292_v56 = vld [vmem:[#allocation5 + $0x7e8] sm:$0xff]  ;;  %v804_v59 = vpack.c.bf16 %v275_v52, %v267_v51  ;;  %v868_v60 = vpack.c.bf16 %v277_v19, %v269_v53 }
  0x8e   :  { %v806_v61 = vpack.c.bf16 %v292_v56, %v284_v55 }
  0x8f   :  { %785 = vmatpush1.bf16.msra.mxu0 %v784_v62  ;;  %v283_v62 = vld [vmem:[#allocation5 + $0x7a0] sm:$0xff] }
  0x90   :  { %849 = vmatpush1.bf16.msra.mxu1 %v848_v63  ;;  %787 = vmatprep.subr.bf16.mxu0 %v786_v0  ;;  %v291_v63 = vld [vmem:[#allocation5 + $0x7e0] sm:$0xff]  ;;  %v870_v0 = vpack.c.bf16 %v294_v58, %v286_v57 }
  0x91   :  { %851 = vmatprep.subr.bf16.mxu1 %v850_v4  ;;  %v808_v3 = vpack.c.bf16 %v291_v63, %v283_v62  ;;  %v872_v4 = vpack.c.bf16 %v293_v2, %v285_v1 }
  0x93   :  { %789 = vmatpush1.bf16.msra.mxu0 %v788_v10 }
  0x94   :  { %853 = vmatpush1.bf16.msra.mxu1 %v852_v11  ;;  %791 = vmatprep.subr.bf16.mxu0 %v790_v12 }
  0x95   :  { %855 = vmatprep.subr.bf16.mxu1 %v854_v17 }
  0x97   :  { %793 = vmatpush1.bf16.msra.mxu0 %v792_v24 }
  0x98   :  { %857 = vmatpush1.bf16.msra.mxu1 %v856_v25  ;;  %795 = vmatprep.subr.bf16.mxu0 %v794_v26 }
  0x99   :  { %859 = vmatprep.subr.bf16.mxu1 %v858_v30 }
  0x9b   :  { %797 = vmatpush1.bf16.msra.mxu0 %v796_v36 }
  0x9c   :  { %861 = vmatpush1.bf16.msra.mxu1 %v860_v37  ;;  %799 = vmatprep.subr.bf16.mxu0 %v798_v38 }
  0x9d   :  { %863 = vmatprep.subr.bf16.mxu1 %v862_v42 }
  0x9f   :  { %801 = vmatpush1.bf16.msra.mxu0 %v800_v48 }
  0xa0   :  { %865 = vmatpush1.bf16.msra.mxu1 %v864_v49  ;;  %803 = vmatprep.subr.bf16.mxu0 %v802_v50 }
  0xa1   :  { %867 = vmatprep.subr.bf16.mxu1 %v866_v54 }
  0xa3   :  { %805 = vmatpush1.bf16.msra.mxu0 %v804_v59 }
  0xa4   :  { %869 = vmatpush1.bf16.msra.mxu1 %v868_v60  ;;  %807 = vmatprep.subr.bf16.mxu0 %v806_v61 }
  0xa5   :  { %871 = vmatprep.subr.bf16.mxu1 %v870_v0 }
  0xa7   :  { %809 = vmatpush1.bf16.msra.mxu0 %v808_v3 }
  0xa8   :  { %873 = vmatpush1.bf16.msra.mxu1 %v872_v4 }
  0xaa   :  { %505 = vmatmul.mubr.f32.vlgmr.msra.gmra.mrb[2].mxu0 %v1003_v16 }
  0xab   :  { %576 = vmatmul.mubr.f32.vlgmr.msra.gmra.mrb[2].mxu1 %v1003_v16 }
 0x13d   :  { %v364_v5 = vpop.f32.mrb[0].mxu0 }
 0x13e   :  { %v435_v6 = vpop.f32.mrb[0].mxu1  ;;  %v366_v7 = vpop.f32.mrb[1].mxu0 }
 0x13f   :  { %v590_v8 = vcombine.low %v364_v5, %v366_v7  ;;  %v437_v9 = vpop.f32.mrb[1].mxu1 }
 0x140   :  { %v591_v10 = vcombine.low %v435_v6, %v437_v9 }
 0x141   :  { %598 = vst [vmem:[#allocation7] sm:$0xff] %v590_v8 }
 0x142   :  { %599 = vst [vmem:[#allocation7 + $0x8] sm:$0xff] %v591_v10 }
 0x17d   :  { %v506_v11 = vpop.f32.mrb[2].mxu0 }
 0x17e   :  { %v577_v12 = vpop.f32.mrb[2].mxu1  ;;  %v508_v13 = vpop.f32.mrb[3].mxu0 }
 0x17f   :  { %v592_v14 = vcombine.low %v506_v11, %v508_v13  ;;  %v579_v15 = vpop.f32.mrb[3].mxu1 }
 0x180   :  { %v593_v17 = vcombine.low %v577_v12, %v579_v15 }
 0x181   :  { %600 = vst [vmem:[#allocation7 + $0x10] sm:$0xff] %v592_v14 }
 0x182   :  { %601 = vst [vmem:[#allocation7 + $0x18] sm:$0xff] %v593_v17 }
 0x183   :  { %935 = shalt.err (!%p932_p6)
}
 0x184   :  { %s936_s10 = scalar_lea.hbm %s1031_s2, 512 }
 0x185   :  { %p937_p7 = scmp.ne.s32.totalorder %s1031_s2, %s936_s10  ;;  %p940_p8 = scmp.lt.u32.totalorder %s936_s10, %s1031_s2 }
 0x187   :  { %p942_p9 = pnand %p940_p8, %p937_p7 }
 0x189   :  { %945 = shalt.err (!%p942_p9)
}
 0x18a   :  { %611 = dma.vmem_to_hbm [thread:$0]  %s609_s6, 512, %s1031_s2, [#allocation4]  }
 0x18b   :  { %950 = dma.done.wait [#allocation4], 512  }
 0x18c   :  { %951 = vsyncadd [#allocation4], 4294966784 }
 0x18d   :  { %615 = vsyncpa [#allocation3], 1 }
 0x18e   :  { %616 = vsyncpa [#allocation6], 1 }
 0x18f   :  { %617 = vsyncpa [#allocation4], 1 }

</bundles_post_ra>
